<compile_context>
chip_gen: v5e
topology: v5e:2x2
jax: 0.10.0
libtpu: 0.0.40
codegen_flags: <defaults>
</compile_context>

<pallas_src>
import functools

import jax
import jax.numpy as jnp
from jax.experimental import pallas as pl
from jax.experimental.pallas import tpu as pltpu


def _round_up(x, m):
    return ((x + m - 1) // m) * m


def _pick_tile(n_padded, t_max, align):
    """Largest multiple of `align` that divides n_padded and is <= t_max."""
    t_max = max(align, min(t_max, n_padded))
    t_max -= t_max % align
    for t in range(t_max, align - 1, -align):
        if n_padded % t == 0:
            return t
    return align


# ----------------------------- kernels -------------------------------------


def _gcn_fused_kernel(a_ref, x_ref, w_ref, b_ref, o_ref, acc_ref, *,
                      tk, x_resident):
    """acc[i] += A[i,k] @ X[k]; at last k: O[i] = acc[i] @ W + b."""
    k = pl.program_id(1)

    @pl.when(k == 0)
    def _():
        acc_ref[...] = jnp.zeros_like(acc_ref)

    if x_resident:
        start = pl.multiple_of(k * tk, 128)
        x = x_ref[pl.ds(start, tk), :]
    else:
        x = x_ref[...]
    # Native-dtype (e.g. bf16) MXU matmul, f32 accumulation.
    acc_ref[...] += jnp.dot(a_ref[...], x, preferred_element_type=jnp.float32)

    @pl.when(k == pl.num_programs(1) - 1)
    def _():
        out = jnp.dot(acc_ref[...], w_ref[...],
                      preferred_element_type=jnp.float32)
        o_ref[...] = (out + b_ref[...]).astype(o_ref.dtype)


def _gcn_pre_kernel(a_ref, xw_ref, b_ref, o_ref, acc_ref, *, tk, x_resident):
    """XW = X @ W precomputed: acc[i] += A[i,k] @ XW[k]; + bias at last k."""
    k = pl.program_id(1)

    @pl.when(k == 0)
    def _():
        acc_ref[...] = jnp.zeros_like(acc_ref)

    if x_resident:
        start = pl.multiple_of(k * tk, 128)
        xw = xw_ref[pl.ds(start, tk), :]
    else:
        xw = xw_ref[...]
    acc_ref[...] += jnp.dot(a_ref[...], xw, preferred_element_type=jnp.float32)

    @pl.when(k == pl.num_programs(1) - 1)
    def _():
        o_ref[...] = (acc_ref[...] + b_ref[...]).astype(o_ref.dtype)


# ----------------------------- wrapper --------------------------------------


def gcn_layer(adj, x, w, b, *, tm=512, tk=1024, x_resident_bytes=4 << 20):
    """GCNLayer forward: out = (A @ X) @ W + b.

    adj : [N, N]     A[dst, src]; 0/1 or edge weights.  Its dtype sets the
                     matmul dtype (pass bf16 for unweighted graphs -> exact).
    x   : [N, F_in]  node features
    w   : [F_in, F_out]  (== torch Linear.weight.T)
    b   : [F_out]
    """
    n, f_in = x.shape
    f_out = w.shape[1]
    out_dtype = x.dtype

    # Matmul dtype follows the adjacency dtype; X/XW are cast ONCE here so the
    # kernel never upcasts whole tiles (perf review item #1).
    mat_dtype = adj.dtype
    f_out_p = _round_up(f_out, 128)          # lane-dense (unmasked) stores

    # Pad only to hardware alignment; pick tiles that divide the padded sizes.
    n_rows = _round_up(n, 8)
    n_cols = _round_up(n, 128)
    tm_cap = tm
    if n_rows >= 16:
        tm_cap = min(tm_cap, max(8, n_rows // 2))   # >=2 row tiles (megacore)
    tm_eff = _pick_tile(n_rows, tm_cap, 8)
    tk_eff = _pick_tile(n_cols, min(tk, n_cols), 128)

    adj_p = adj
    if adj_p.shape != (n_rows, n_cols):
        adj_p = jnp.pad(adj_p, ((0, n_rows - n), (0, n_cols - n)))
    b_p = jnp.pad(b.astype(jnp.float32), (0, f_out_p - f_out)).reshape(1, f_out_p)

    grid = (n_rows // tm_eff, n_cols // tk_eff)
    abytes = jnp.dtype(mat_dtype).itemsize
    obytes = jnp.dtype(out_dtype).itemsize

    # Accumulate over the narrower feature width (padded widths compared).
    fused = f_out_p >= f_in

    if fused:
        x_p = jnp.pad(x.astype(mat_dtype), ((0, n_cols - n), (0, 0)))
        feat = f_in
    else:
        # XW = X @ W precomputed once; the N^2-scale matmul becomes A @ XW.
        xw = jnp.dot(x, w, preferred_element_type=jnp.float32,
                     precision=jax.lax.Precision.HIGHEST).astype(mat_dtype)
        x_p = jnp.pad(xw, ((0, n_cols - n), (0, f_out_p - f_out)))
        feat = f_out_p

    # Keep X/XW fully resident in VMEM (loaded once) when it fits.
    resident = n_cols * feat * abytes <= x_resident_bytes
    if resident:
        x_spec = pl.BlockSpec((n_cols, feat), lambda i, k: (0, 0))
    else:
        x_spec = pl.BlockSpec((tk_eff, feat), lambda i, k: (k, 0))

    a_spec = pl.BlockSpec((tm_eff, tk_eff), lambda i, k: (i, k))
    o_spec = pl.BlockSpec((tm_eff, f_out_p), lambda i, k: (i, 0))
    b_spec = pl.BlockSpec((1, f_out_p), lambda i, k: (0, 0))

    # Explicit VMEM budget: 2x A tile + 2x X block + (2x W) + acc + 2x out.
    x_block_bytes = (n_cols if resident else tk_eff) * feat * abytes
    w_bytes = f_in * f_out_p * 4 if fused else 0
    est = (2 * tm_eff * tk_eff * abytes + 2 * x_block_bytes + 2 * w_bytes
           + 2 * f_out_p * 4 + tm_eff * feat * 4
           + 2 * tm_eff * f_out_p * obytes)
    vmem_limit = min(max(int(est * 1.5) + (4 << 20), 32 << 20), 64 << 20)

    cparams = pltpu.CompilerParams(
        dimension_semantics=("parallel", "arbitrary"),
        vmem_limit_bytes=vmem_limit)
    flops = 2 * n_rows * n_cols * feat
    if fused:
        flops += 2 * n_rows * f_in * f_out_p
    bytes_accessed = int(adj_p.size * abytes + x_p.size * abytes + w_bytes
                         + f_out_p * 4 + n_rows * f_out_p * obytes)
    ce = pl.CostEstimate(flops=int(flops), transcendentals=0,
                         bytes_accessed=bytes_accessed)

    if fused:
        w_p = jnp.pad(w.astype(jnp.float32), ((0, 0), (0, f_out_p - f_out)))
        kernel = functools.partial(_gcn_fused_kernel, tk=tk_eff,
                                   x_resident=resident)
        out_p = pl.pallas_call(
            kernel,
            out_shape=jax.ShapeDtypeStruct((n_rows, f_out_p), out_dtype),
            grid=grid,
            in_specs=[
                a_spec,                                              # A tile
                x_spec,                                              # X
                pl.BlockSpec((f_in, f_out_p), lambda i, k: (0, 0)),  # W (resident)
                b_spec,                                              # bias
            ],
            out_specs=o_spec,
            scratch_shapes=[pltpu.VMEM((tm_eff, f_in), jnp.float32)],
            compiler_params=cparams,
            cost_estimate=ce,
        )(adj_p, x_p, w_p, b_p)
    else:
        kernel = functools.partial(_gcn_pre_kernel, tk=tk_eff,
                                   x_resident=resident)
        out_p = pl.pallas_call(
            kernel,
            out_shape=jax.ShapeDtypeStruct((n_rows, f_out_p), out_dtype),
            grid=grid,
            in_specs=[a_spec, x_spec, b_spec],
            out_specs=o_spec,
            scratch_shapes=[pltpu.VMEM((tm_eff, f_out_p), jnp.float32)],
            compiler_params=cparams,
            cost_estimate=ce,
        )(adj_p, x_p, b_p)

    return out_p[:n, :f_out]


# ------------------------------- demo ---------------------------------------


if __name__ == "__main__":
    key = jax.random.PRNGKey(0)
    (k_adj, k_x, k_w, k_b,
     k_adj2, k_ew2, k_x2, k_w2, k_b2, _) = jax.random.split(key, 10)

    def ref_gcn(adj, x, w, b):
        h = jnp.dot(adj, x, precision=jax.lax.Precision.HIGHEST)
        return jnp.dot(h, w, precision=jax.lax.Precision.HIGHEST) + b

    # ---- Case 1: GCNLayer(weights=False), fused path, bf16 A & X -----------
    N, in_feats, out_feats = 256, 8, 32
    adj = (jax.random.uniform(k_adj, (N, N)) < 0.3).astype(jnp.float32)
    x = jax.random.normal(k_x, (N, in_feats), dtype=jnp.float32)
    bound = 1.0 / jnp.sqrt(jnp.float32(in_feats))
    w = jax.random.uniform(k_w, (in_feats, out_feats), jnp.float32,
                           minval=-bound, maxval=bound)   # torch weight.T
    b = jax.random.uniform(k_b, (out_feats,), jnp.float32,
                           minval=-bound, maxval=bound)

    # 0/1 adjacency is exact in bf16; X is cast to bf16 once in the wrapper.
    out = gcn_layer(adj.astype(jnp.bfloat16), x, w, b)
    out = jax.block_until_ready(out)
    x_bf = x.astype(jnp.bfloat16).astype(jnp.float32)   # match the bf16 rounding
    ref = ref_gcn(adj, x_bf, w, b)
    assert out.shape == (N, out_feats)
    assert jnp.allclose(out, ref, atol=2e-3, rtol=2e-3), "case 1 mismatch"

    # ---- Case 2: GCNLayer(weights=True), A @ (X@W) path, f32, streamed XW --
    N2, in2, out2 = 200, 256, 16     # non-aligned N exercises padding
    adj2 = (jax.random.uniform(k_adj2, (N2, N2)) < 0.25).astype(jnp.float32)
    adj2 = adj2 * jax.random.uniform(k_ew2, (N2, N2), dtype=jnp.float32)
    x2 = jax.random.normal(k_x2, (N2, in2), dtype=jnp.float32)
    bound2 = 1.0 / jnp.sqrt(jnp.float32(in2))
    w2 = jax.random.uniform(k_w2, (in2, out2), jnp.float32,
                            minval=-bound2, maxval=bound2)
    b2 = jax.random.uniform(k_b2, (out2,), jnp.float32,
                            minval=-bound2, maxval=bound2)

    # Weighted edges -> keep f32 adjacency; x_resident_bytes=0 exercises the
    # streamed-XW code path.
    out2_res = gcn_layer(adj2, x2, w2, b2, x_resident_bytes=0)
    out2_res = jax.block_until_ready(out2_res)
    ref2 = ref_gcn(adj2, x2, w2, b2)
    assert out2_res.shape == (N2, out2)
    assert jnp.allclose(out2_res, ref2, atol=1e-3, rtol=1e-3), "case 2 mismatch"

    print("KERNEL_OK")
</pallas_src>

<mosaic_0001>
module attributes {stable_mosaic.version = 11 : i64} {
  func.func @_gcn_fused_kernel(%arg0: i32, %arg1: i32, %arg2: memref<128x256xbf16, #tpu.memory_space<vmem>>, %arg3: memref<256x8xbf16, #tpu.memory_space<vmem>>, %arg4: memref<8x128xf32, #tpu.memory_space<vmem>>, %arg5: memref<1x128xf32, #tpu.memory_space<vmem>>, %arg6: memref<128x128xf32, #tpu.memory_space<vmem>>, %arg7: memref<128x8xf32, #tpu.memory_space<vmem>>) attributes {dimension_semantics = [#tpu.dimension_semantics<parallel>, #tpu.dimension_semantics<arbitrary>], iteration_bounds = array<i64: 2, 1>, scalar_prefetch = 0 : i64, scratch_operands = 1 : i64, tpu.core_type = #tpu.core_type<tc>, window_params = [{transform_indices = @transform_0, window_bounds = array<i64: 128, 256>}, {pipeline_mode = #tpu.pipeline_mode<synchronous>, transform_indices = @transform_1, window_bounds = array<i64: 256, 8>}, {pipeline_mode = #tpu.pipeline_mode<synchronous>, transform_indices = @transform_2, window_bounds = array<i64: 8, 128>}, {pipeline_mode = #tpu.pipeline_mode<synchronous>, transform_indices = @transform_3, window_bounds = array<i64: 1, 128>}, {transform_indices = @transform_4, window_bounds = array<i64: 128, 128>}]} {
    %c0_i32 = arith.constant 0 : i32
    %0 = arith.cmpi eq, %arg1, %c0_i32 : i32
    %1 = arith.extui %0 : i1 to i32
    %c0_i32_0 = arith.constant 0 : i32
    %2 = arith.cmpi ne, %1, %c0_i32_0 : i32
    scf.if %2 {
      %cst_9 = arith.constant 0.000000e+00 : f32
      %15 = vector.broadcast %cst_9 : f32 to vector<128x8xf32>
      %c0_10 = arith.constant 0 : index
      %c0_11 = arith.constant 0 : index
      %16 = vector.load %arg7[%c0_10, %c0_11] : memref<128x8xf32, #tpu.memory_space<vmem>>, vector<128x8xf32>
      tpu.vector_store %arg7[%c0_10, %c0_11], %15 {strides = array<i32>} : memref<128x8xf32, #tpu.memory_space<vmem>>, vector<128x8xf32>,
    } else {
    }
    %c256_i32 = arith.constant 256 : i32
    %3 = arith.muli %arg1, %c256_i32 : i32
    %4 = tpu.assume_multiple %3, 128 : i32
    %5 = arith.index_cast %4 : i32 to index
    %c0 = arith.constant 0 : index
    %6 = vector.load %arg3[%5, %c0] : memref<256x8xbf16, #tpu.memory_space<vmem>>, vector<256x8xbf16>
    %c0_1 = arith.constant 0 : index
    %c0_2 = arith.constant 0 : index
    %7 = vector.load %arg7[%c0_1, %c0_2] : memref<128x8xf32, #tpu.memory_space<vmem>>, vector<128x8xf32>
    %c0_3 = arith.constant 0 : index
    %c0_4 = arith.constant 0 : index
    %8 = vector.load %arg2[%c0_3, %c0_4] : memref<128x256xbf16, #tpu.memory_space<vmem>>, vector<128x256xbf16>
    %cst = arith.constant dense<0.000000e+00> : vector<128x8xf32>
    %9 = tpu.matmul %8, %6, %cst {dimension_numbers = #tpu.dot_dimension_numbers<[1], [0], [0], [1], [0, 0, 1, 1], [], []>} : vector<128x256xbf16>, vector<256x8xbf16>, vector<128x8xf32> -> vector<128x8xf32>
    %10 = arith.addf %7, %9 : vector<128x8xf32>
    %c0_5 = arith.constant 0 : index
    %c0_6 = arith.constant 0 : index
    %11 = vector.load %arg7[%c0_5, %c0_6] : memref<128x8xf32, #tpu.memory_space<vmem>>, vector<128x8xf32>
    tpu.vector_store %arg7[%c0_5, %c0_6], %10 {strides = array<i32>} : memref<128x8xf32, #tpu.memory_space<vmem>>, vector<128x8xf32>,
    %c0_i32_7 = arith.constant 0 : i32
    %12 = arith.cmpi eq, %arg1, %c0_i32_7 : i32
    %13 = arith.extui %12 : i1 to i32
    %c0_i32_8 = arith.constant 0 : i32
    %14 = arith.cmpi ne, %13, %c0_i32_8 : i32
    scf.if %14 {
      %c0_9 = arith.constant 0 : index
      %c0_10 = arith.constant 0 : index
      %15 = vector.load %arg7[%c0_9, %c0_10] : memref<128x8xf32, #tpu.memory_space<vmem>>, vector<128x8xf32>
      %c0_11 = arith.constant 0 : index
      %c0_12 = arith.constant 0 : index
      %16 = vector.load %arg4[%c0_11, %c0_12] : memref<8x128xf32, #tpu.memory_space<vmem>>, vector<8x128xf32>
      %cst_13 = arith.constant dense<0.000000e+00> : vector<128x128xf32>
      %17 = tpu.matmul %15, %16, %cst_13 {dimension_numbers = #tpu.dot_dimension_numbers<[1], [0], [0], [1], [0, 0, 1, 1], [], []>} : vector<128x8xf32>, vector<8x128xf32>, vector<128x128xf32> -> vector<128x128xf32>
      %c0_14 = arith.constant 0 : index
      %c0_15 = arith.constant 0 : index
      %18 = vector.load %arg5[%c0_14, %c0_15] : memref<1x128xf32, #tpu.memory_space<vmem>>, vector<1x128xf32>
      %19 = vector.broadcast %18 : vector<1x128xf32> to vector<128x128xf32>
      %20 = arith.addf %17, %19 : vector<128x128xf32>
      %c0_16 = arith.constant 0 : index
      %c0_17 = arith.constant 0 : index
      %21 = vector.load %arg6[%c0_16, %c0_17] : memref<128x128xf32, #tpu.memory_space<vmem>>, vector<128x128xf32>
      tpu.vector_store %arg6[%c0_16, %c0_17], %20 {strides = array<i32>} : memref<128x128xf32, #tpu.memory_space<vmem>>, vector<128x128xf32>,
    } else {
    }
    return
  }
  func.func @transform_0(%arg0: i32, %arg1: i32) -> (i32, i32) {
    %c0_i32 = arith.constant 0 : i32
    return %arg0, %arg1 : i32, i32
  }
  func.func @transform_1(%arg0: i32, %arg1: i32) -> (i32, i32) {
    %c0_i32 = arith.constant 0 : i32
    %c0_i32_0 = arith.constant 0 : i32
    %c0_i32_1 = arith.constant 0 : i32
    return %c0_i32, %c0_i32_0 : i32, i32
  }
  func.func @transform_2(%arg0: i32, %arg1: i32) -> (i32, i32) {
    %c0_i32 = arith.constant 0 : i32
    %c0_i32_0 = arith.constant 0 : i32
    %c0_i32_1 = arith.constant 0 : i32
    return %c0_i32, %c0_i32_0 : i32, i32
  }
  func.func @transform_3(%arg0: i32, %arg1: i32) -> (i32, i32) {
    %c0_i32 = arith.constant 0 : i32
    %c0_i32_0 = arith.constant 0 : i32
    %c0_i32_1 = arith.constant 0 : i32
    return %c0_i32, %c0_i32_0 : i32, i32
  }
  func.func @transform_4(%arg0: i32, %arg1: i32) -> (i32, i32) {
    %c0_i32 = arith.constant 0 : i32
    %c0_i32_0 = arith.constant 0 : i32
    return %arg0, %c0_i32 : i32, i32
  }
}

</mosaic_0001>

<bundles_post_ra>
// kernel: tpu_custom_call.1
= control target key start
LH: loop header
LB: loop body
LE: loop exit
PB: predicated region body
PF: predicated region fallthrough
CT: control target
= control target key end

     0   :  { %9 = vsyncpa [#allocation4], 0  ;;  %s1593_s0 = inlined_call_operand.hbm [shape: bf16[256,256], index: 0, kind: input, shape index: {}]   ;;  %s1594_s1 = inlined_call_operand.vmem [shape: bf16[256,8], index: 1, kind: input, shape index: {}]   ;;  %s1595_s2 = inlined_call_operand.vmem [shape: f32[8,128], index: 2, kind: input, shape index: {}]   ;;  %s1596_s3 = inlined_call_operand.vmem [shape: f32[1,128], index: 3, kind: input, shape index: {}]   ;;  %s1597_s4 = inlined_call_operand.hbm [shape: f32[256,128], index: 4, kind: output, shape index: {}]  }
   0x1   :  { %11 = vsyncpa [#allocation4 + $0x1], 0 }
   0x2   :  { %12 = vsyncpa [#allocation5], 0 }
   0x3   :  { %14 = vsyncpa [#allocation5 + $0x1], 0  ;;  %s1314_s15 = smov 0   ;;  %s1316_s16 = smov 0  }
   0x4   :  { %s1318_s17 = smov 0   ;;  %s1320_s18 = smov 0  }
   0x5   :  { %s1322_s19 = smov 0   ;;  %s1324_s20 = smov 0  }
   0x6 LB: > { %s890_s21 = sadd.s32 4294967295, %s1282_s20   ;;  %s891_s22 = sadd.s32 4294967294, %s1282_s20   ;;  %s1282_s20 = sphi %s1324_s20, %s20_s20   ;;  %s1278_s19 = sphi %s1322_s19, %s1606_s19   ;;  %s1274_s18 = sphi %s1320_s18, %s1605_s18   ;;  %s1270_s17 = sphi %s1318_s17, %s1604_s17   ;;  %s1266_s16 = sphi %s1316_s16, %s1603_s16   ;;  %s1262_s15 = sphi %s1314_s15, %s1602_s15  }
   0x7   : > { %s32_s23 = sadd.s32 1, %s1278_s19  ;;  %s41_s24 = sadd.s32 1, %s1270_s17 }
   0x8   : > { %p34_p0 = scmp.ge.s32.totalorder %s32_s23, 2  ;;  %p48_p1 = scmp.ne.s32.totalorder %s1270_s17, %s1266_s16 }
   0x9   : > { %p49_p2 = scmp.eq.s32.totalorder %s1282_s20, 0  ;;  %p54_p3 = scmp.ne.s32.totalorder %s1266_s16, %s1262_s15 }
   0xa   : > { %s1608_s23 = smov (%p34_p0, %s32_s23), 0  ;;  %p55_p5 = scmp.eq.s32.totalorder %s890_s21, 0 }
   0xb   : > { %p1355_p4 = por %p49_p2, %p48_p1  ;;  %s36_s26 = ssub.s32 %s1278_s19, %s1608_s23 }
   0xc   : > { %p141_p6 = scmp.eq.s32.totalorder %s890_s21, 1  ;;  %p39_p7 = scmp.eq.s32.totalorder %s36_s26, 0 }
   0xd   : > { %p1361_p8 = por %p55_p5, %p54_p3  ;;  %p147_p10 = scmp.eq.s32.totalorder %s891_s22, 1 }
   0xe   : > { %p1365_p9 = por %p141_p6, %p48_p1  ;;  %p893_p12 = scmp.ge.s32.totalorder %s1282_s20, 2 }
   0xf   : > { %s1370_s29 = scalar_select %p39_p7, %s1270_s17, %s41_s24  }
  0x10   : > { %p1372_p11 = por %p147_p10, %p54_p3  ;;  %p1114_p13 = scmp.lt.s32.totalorder %s1282_s20, 2 }
  0x11   : > { %s176_s5 = sand.u32 1, %s1270_s17   ;;  %s1051_s7 = sshll.u32 %s1278_s19, 7 }
  0x12   : > { %s894_s6 = sshll.u32 %s176_s5, 7  ;;  %s188_s10 = scalar_lea.hbm %s1593_s0, %s1051_s7 }
  0x13   : > { %s180_s11 = scalar_lea.vmem [#allocation3], %s894_s6  ;;  %s189_s13 = sshll.u32 %s188_s10, 4  ;;  %s190_s13 = int_to_ptr.hbm [resolvable:$true] %s189_s13 }
  0x14   : > { %s191_s12 = sshll.u32 %s180_s11, 4  ;;  %p1107_p0 = pnand %p1114_p13, %p1355_p4  ;;  %s192_s12 = int_to_ptr.vmem [resolvable:$true] %s191_s12 }
  0x15   : > { %p898_p1 = scmp.ge.s32.totalorder %s1282_s20, 1  ;;  %s177_s14 = scalar_lea.sflag [#allocation4], %s176_s5 }
  0x16   : > { %s1284_s21 = smov 128   ;;  %s1285_s22 = smov 8  }
  0x17   : > { %1109 = dma.hbm_to_vmem [thread:$0]  (!%p1107_p0), %s190_s13, 2048, %s192_s12, %s177_s14, %s1284_s21, %s1284_s21, %s1285_s22  }
  0x18   : > { %p199_p2 = scmp.lt.s32.totalorder %s1282_s20, 3 }
  0x1a   : > { %p200_p3 = pnand %p898_p1, %p199_p2 }
  0x1b   : > { %s1388_s24 = sand.u32 (!%p200_p3), 1, %s1266_s16  }
  0x1c   : > { %203 = sbr.rel (%p200_p3) target bundleno = 455 (0x1c7), region = 36  ;;  %s899_s26 = sshll.u32 (!%p200_p3), %s1388_s24, 7 }
  0x1d   : > { %s206_s6 = scalar_lea.sflag (!%p200_p3), [#allocation4], %s1388_s24  ;;  %s1394_s25 = scalar_lea.vmem (!%p200_p3), [#allocation3], %s899_s26 }
  0x21   : > { %1253 = dma.done.wait (%p1361_p8), %s206_s6, 2048  }
  0x22   : > { %1255 = vsyncadd (%p1361_p8), %s206_s6, 4294965248  ;;  %v1059_v0 = vld [vmem:[%s1594_s1 + $0x38] sm:$0xff]  ;;  %v1058_v2 = vld [vmem:[%s1594_s1 + $0x30] sm:$0xff]  ;;  %vm242_vm0 = vcmask 64512   ;;  %s1536_s14 = scalar_lea.vmem [#allocation6], %s899_s26  ;;  %s1084_s26 = sshll.u32 %s1274_s18, 7 }
  0x23   : > { %v1067_v1 = vld [vmem:[%s1594_s1 + $0x78] sm:$0xff]  ;;  %504 = vmatpush.bf16.msra.mxu0 %v1059_v0  ;;  %v1066_v3 = vld [vmem:[%s1594_s1 + $0x70] sm:$0xff]  ;;  %1085 = vmatpush.bf16.msra.mxu3 %v1059_v0  ;;  %v1057_v4 = vld [vmem:[%s1594_s1 + $0x28] sm:$0xff]  ;;  %v1286_v0 = vmov 0.0   ;;  %s800_s6 = scalar_lea.hbm %s1597_s4, %s1084_s26  ;;  %s801_s5 = sshll.u32 %s1536_s14, 4  ;;  %s802_s5 = int_to_ptr.vmem [resolvable:$true] %s801_s5 }
  0x24   : > { %553 = vmatpush.bf16.msra.mxu1 %v1067_v1  ;;  %v1065_v5 = vld [vmem:[%s1594_s1 + $0x68] sm:$0xff]  ;;  %v1056_v6 = vld [vmem:[%s1594_s1 + $0x20] sm:$0xff]  ;;  %v1055_v8 = vld [vmem:[%s1594_s1 + $0x18] sm:$0xff]  ;;  %243 = vst.msk [vmem:[#allocation2] sm:$0xff] %vm242_vm0, %v1286_v0  ;;  %s803_s7 = sshll.u32 %s800_s6, 4  ;;  %s789_s8 = scalar_lea.sflag [#allocation5], %s1388_s24  ;;  %s804_s7 = int_to_ptr.hbm [resolvable:$true] %s803_s7 }
  0x25   : > { %v1064_v7 = vld [vmem:[%s1594_s1 + $0x60] sm:$0xff]  ;;  %v1063_v9 = vld [vmem:[%s1594_s1 + $0x58] sm:$0xff]  ;;  %v1054_v10 = vld [vmem:[%s1594_s1 + $0x10] sm:$0xff]  ;;  %244 = vst.msk [vmem:[#allocation2 + $0x8] sm:$0xff] %vm242_vm0, %v1286_v0  ;;  %s1214_s9 = sshra.s32 %s804_s7, 4  ;;  %s1215_s9 = int_to_ptr.hbm [resolvable:$true] %s1214_s9 }
  0x26   : > { %v1062_v11 = vld [vmem:[%s1594_s1 + $0x50] sm:$0xff]  ;;  %v1053_v12 = vld [vmem:[%s1594_s1 + $0x8] sm:$0xff]  ;;  %v1052_v14 = vld [vmem:[%s1594_s1] sm:$0xff]  ;;  %245 = vst.msk [vmem:[#allocation2 + $0x10] sm:$0xff] %vm242_vm0, %v1286_v0  ;;  %s1216_s10 = scalar_lea.hbm %s1215_s9, 128  ;;  %p1221_p7 = scmp.lt.s32.totalorder %s1215_s9, %s1597_s4 }
  0x27   : > { %505 = vmatpush.bf16.msra.mxu0 %v1058_v2  ;;  %1086 = vmatpush.bf16.msra.mxu3 %v1058_v2  ;;  %v1061_v13 = vld [vmem:[%s1594_s1 + $0x48] sm:$0xff]  ;;  %v1060_v15 = vld [vmem:[%s1594_s1 + $0x40] sm:$0xff]  ;;  %v911_v25 = vld [vmem:[%s1394_s25 + $0x10] sm:$0xf]  ;;  %246 = vst.msk [vmem:[#allocation2 + $0x18] sm:$0xff] %vm242_vm0, %v1286_v0  ;;  %p1217_p4 = scmp.ne.s32.totalorder %s1215_s9, %s1216_s10 }
  0x28   : > { %554 = vmatpush.bf16.msra.mxu1 %v1066_v3  ;;  %v903_v16 = vld [vmem:[%s1394_s25] sm:$0xf]  ;;  %v1069_v17 = vld [vmem:[%s1394_s25 + $0x4] sm:$0xf0]  ;;  %v1068_v18 = vld [vmem:[%s1394_s25 + $0x4] sm:$0xf] }
  0x29   : > { %v905_v19 = vld [vmem:[%s1394_s25 + $0x8] sm:$0xf0]  ;;  %v951_v20 = vld [vmem:[%s1394_s25 + $0x60] sm:$0xf]  ;;  %v1081_v21 = vld [vmem:[%s1394_s25 + $0x64] sm:$0xf0]  ;;  %v904_v22 = vor.u32 %v1069_v17, %v903_v16  ;;  %p1218_p5 = pnand %p1217_p4, %p1365_p9 }
  0x2a   : > { %v908_v23 = vor.u32 %v1068_v18, %v905_v19  ;;  %v952_v24 = vor.u32 %v1081_v21, %v951_v20  ;;  %v1071_v26 = vld [vmem:[%s1394_s25 + $0x14] sm:$0xf0]  ;;  %v1070_v27 = vld [vmem:[%s1394_s25 + $0x14] sm:$0xf]  ;;  %v913_v28 = vld [vmem:[%s1394_s25 + $0x18] sm:$0xf0] }
  0x2b   : > { %506 = vmatpush.bf16.msra.mxu0 %v1057_v4  ;;  %1087 = vmatpush.bf16.msra.mxu3 %v1057_v4  ;;  %v959_v29 = vld [vmem:[%s1394_s25 + $0x70] sm:$0xf]  ;;  %v1083_v30 = vld [vmem:[%s1394_s25 + $0x74] sm:$0xf0]  ;;  %v912_v31 = vor.u32 %v1071_v26, %v911_v25  ;;  %v916_v32 = vor.u32 %v1070_v27, %v913_v28  ;;  %v919_v34 = vld [vmem:[%s1394_s25 + $0x20] sm:$0xf]  ;;  %p1219_p6 = pneg %p1218_p5 }
  0x2c   : > { %555 = vmatpush.bf16.msra.mxu1 %v1065_v5  ;;  %v960_v33 = vor.u32 %v1083_v30, %v959_v29  ;;  %v1073_v35 = vld [vmem:[%s1394_s25 + $0x24] sm:$0xf0]  ;;  %v1072_v36 = vld [vmem:[%s1394_s25 + $0x24] sm:$0xf]  ;;  %v921_v37 = vld [vmem:[%s1394_s25 + $0x28] sm:$0xf0] }
  0x2d   : > { %v1080_v38 = vld [vmem:[%s1394_s25 + $0x64] sm:$0xf]  ;;  %v953_v39 = vld [vmem:[%s1394_s25 + $0x68] sm:$0xf0]  ;;  %v920_v40 = vor.u32 %v1073_v35, %v919_v34  ;;  %v924_v41 = vor.u32 %v1072_v36, %v921_v37  ;;  %v927_v43 = vld [vmem:[%s1394_s25 + $0x30] sm:$0xf] }
  0x2e   : > { %v956_v42 = vor.u32 %v1080_v38, %v953_v39  ;;  %v1075_v44 = vld [vmem:[%s1394_s25 + $0x34] sm:$0xf0]  ;;  %v1074_v45 = vld [vmem:[%s1394_s25 + $0x34] sm:$0xf]  ;;  %v929_v46 = vld [vmem:[%s1394_s25 + $0x38] sm:$0xf0] }
  0x2f   : > { %507 = vmatpush.bf16.msra.mxu0 %v1056_v6  ;;  %1088 = vmatpush.bf16.msra.mxu3 %v1056_v6  ;;  %v1082_v47 = vld [vmem:[%s1394_s25 + $0x74] sm:$0xf]  ;;  %v961_v48 = vld [vmem:[%s1394_s25 + $0x78] sm:$0xf0]  ;;  %v928_v49 = vor.u32 %v1075_v44, %v927_v43  ;;  %v932_v50 = vor.u32 %v1074_v45, %v929_v46  ;;  %v935_v52 = vld [vmem:[%s1394_s25 + $0x40] sm:$0xf] }
  0x30   : > { %556 = vmatpush.bf16.msra.mxu1 %v1064_v7  ;;  %v964_v51 = vor.u32 %v1082_v47, %v961_v48  ;;  %v1077_v53 = vld [vmem:[%s1394_s25 + $0x44] sm:$0xf0]  ;;  %v1076_v54 = vld [vmem:[%s1394_s25 + $0x44] sm:$0xf]  ;;  %v937_v55 = vld [vmem:[%s1394_s25 + $0x48] sm:$0xf0] }
  0x31   : > { %v936_v56 = vor.u32 %v1077_v53, %v935_v52  ;;  %v940_v57 = vor.u32 %v1076_v54, %v937_v55  ;;  %v943_v58 = vld [vmem:[%s1394_s25 + $0x50] sm:$0xf]  ;;  %v1079_v59 = vld [vmem:[%s1394_s25 + $0x54] sm:$0xf0]  ;;  %v1078_v60 = vld [vmem:[%s1394_s25 + $0x54] sm:$0xf] }
  0x32   : > { %v945_v61 = vld [vmem:[%s1394_s25 + $0x58] sm:$0xf0]  ;;  %v944_v62 = vor.u32 %v1079_v59, %v943_v58  ;;  %247 = vst.msk [vmem:[#allocation2 + $0x20] sm:$0xff] %vm242_vm0, %v1286_v0  ;;  %v298_v16 = vld [vmem:[#allocation2 + $0x10] sm:$0xff]  ;;  %s1220_s25 = scalar_lea.hbm %s1597_s4, 256 }
  0x33   : > { %508 = vmatpush.bf16.msra.mxu0 %v1055_v8  ;;  %1089 = vmatpush.bf16.msra.mxu3 %v1055_v8  ;;  %v948_v63 = vor.u32 %v1078_v60, %v945_v61  ;;  %248 = vst.msk [vmem:[#allocation2 + $0x28] sm:$0xff] %vm242_vm0, %v1286_v0  ;;  %p1222_p8 = scmp.lt.s32.totalorder %s1220_s25, %s1216_s10 }
  0x34   : > { %557 = vmatpush.bf16.msra.mxu1 %v1063_v9  ;;  %249 = vst.msk [vmem:[#allocation2 + $0x30] sm:$0xff] %vm242_vm0, %v1286_v0 }
  0x35   : > { %250 = vst.msk [vmem:[#allocation2 + $0x38] sm:$0xff] %vm242_vm0, %v1286_v0  ;;  %p1223_p10 = por %p1222_p8, %p1221_p7 }
  0x36   : > { %251 = vst.msk [vmem:[#allocation2 + $0x40] sm:$0xff] %vm242_vm0, %v1286_v0 }
  0x37   : > { %509 = vmatpush.bf16.msra.mxu0 %v1054_v10  ;;  %1090 = vmatpush.bf16.msra.mxu3 %v1054_v10  ;;  %252 = vst.msk [vmem:[#allocation2 + $0x48] sm:$0xff] %vm242_vm0, %v1286_v0  ;;  %p1224_p13 = pnand %p1223_p10, %p1219_p6 }
  0x38   : > { %558 = vmatpush.bf16.msra.mxu1 %v1062_v11  ;;  %253 = vst.msk [vmem:[#allocation2 + $0x50] sm:$0xff] %vm242_vm0, %v1286_v0 }
  0x39   : > { %254 = vst.msk [vmem:[#allocation2 + $0x58] sm:$0xff] %vm242_vm0, %v1286_v0  ;;  %v300_v30 = vld [vmem:[#allocation2 + $0x20] sm:$0xff] }
  0x3a   : > { %255 = vst.msk [vmem:[#allocation2 + $0x60] sm:$0xff] %vm242_vm0, %v1286_v0  ;;  %v301_v38 = vld [vmem:[#allocation2 + $0x28] sm:$0xff] }
  0x3b   : > { %510 = vmatpush.bf16.msra.mxu0 %v1053_v12  ;;  %1091 = vmatpush.bf16.msra.mxu3 %v1053_v12  ;;  %256 = vst.msk [vmem:[#allocation2 + $0x68] sm:$0xff] %vm242_vm0, %v1286_v0  ;;  %v302_v48 = vld [vmem:[#allocation2 + $0x30] sm:$0xff] }
  0x3c   : > { %559 = vmatpush.bf16.msra.mxu1 %v1061_v13  ;;  %257 = vst.msk [vmem:[#allocation2 + $0x70] sm:$0xff] %vm242_vm0, %v1286_v0  ;;  %v303_v58 = vld [vmem:[#allocation2 + $0x38] sm:$0xff] }
  0x3d   : > { %258 = vst.msk [vmem:[#allocation2 + $0x78] sm:$0xff] %vm242_vm0, %v1286_v0 }
  0x3f   : > { %511 = vmatpush.bf16.msra.mxu0 %v1052_v14  ;;  %1092 = vmatpush.bf16.msra.mxu3 %v1052_v14 }
  0x40   : > { %560 = vmatpush.bf16.msra.mxu1 %v1060_v15 }
  0x41   : > { %v308_v35 = vld [vmem:[#allocation2 + $0x60] sm:$0xff] }
  0x42   : > { %512 = vmatmul.bf16.vlgmr.msra.gmra.mxu0 %v904_v22  ;;  %542 = vmatmul.bf16.vlgmr.msra.gmra.mxu3 %v952_v24  ;;  %v309_v45 = vld [vmem:[#allocation2 + $0x68] sm:$0xff] }
  0x43   : > { %1093 = vmatpush.bf16.msrb.mxu3 %v1067_v1  ;;  %561 = vmatmul.bf16.vlgmr.msra.gmra.mxu1 %v908_v23  ;;  %v654_v1 = vld [vmem:[%s1595_s2] sm:$0xff]  ;;  %v299_v23 = vld [vmem:[#allocation2 + $0x18] sm:$0xff]  ;;  %v310_v55 = vld [vmem:[#allocation2 + $0x70] sm:$0xff] }
  0x44   : > { %722 = vmatpush.msra.mxu2 %v654_v1 }
  0x47   : > { %1094 = vmatpush.bf16.msrb.mxu3 %v1066_v3  ;;  %v296_v3 = vld [vmem:[#allocation2] sm:$0xff] }
  0x4b   : > { %1095 = vmatpush.bf16.msrb.mxu3 %v1065_v5 }
  0x4f   : > { %1096 = vmatpush.bf16.msrb.mxu3 %v1064_v7 }
  0x52   : > { %517 = vmatmul.bf16.gmra.mxu0 %v912_v31  ;;  %547 = vmatmul.bf16.gmra.mxu3 %v960_v33 }
  0x53   : > { %1097 = vmatpush.bf16.msrb.mxu3 %v1063_v9  ;;  %566 = vmatmul.bf16.gmra.mxu1 %v916_v32  ;;  %v297_v9 = vld [vmem:[#allocation2 + $0x8] sm:$0xff] }
  0x57   : > { %1098 = vmatpush.bf16.msrb.mxu3 %v1062_v11 }
  0x5b   : > { %1099 = vmatpush.bf16.msrb.mxu3 %v1061_v13 }
  0x5f   : > { %1100 = vmatpush.bf16.msrb.mxu3 %v1060_v15 }
  0x62   : > { %522 = vmatmul.bf16.gmra.mxu0 %v920_v40  ;;  %591 = vmatmul.bf16.vlgmr.msrb.gmra.mxu3 %v956_v42 }
  0x63   : > { %571 = vmatmul.bf16.gmra.mxu1 %v924_v41  ;;  %1101 = vmatpush.msra.mxu3 %v654_v1  ;;  %v311_v1 = vld [vmem:[#allocation2 + $0x78] sm:$0xff] }
  0x72   : > { %527 = vmatmul.bf16.gmra.mxu0 %v928_v49  ;;  %596 = vmatmul.bf16.gmra.mxu3 %v964_v51 }
  0x73   : > { %576 = vmatmul.bf16.gmra.mxu1 %v932_v50 }
  0x82   : > { %532 = vmatmul.bf16.gmra.mxu0 %v936_v56 }
  0x83   : > { %581 = vmatmul.bf16.gmra.mxu1 %v940_v57 }
  0x92   : > { %537 = vmatmul.bf16.gmra.mxu0 %v944_v62 }
  0x93   : > { %586 = vmatmul.bf16.gmra.mxu1 %v948_v63 }
  0xbf   : > { %v513_v2 = vpop.f32.mrf.mxu0 }
  0xc0   : > { %v562_v4 = vpop.f32.mrf.mxu1 }
  0xc1   : > { %v563_v5 = vadd.f32 %v562_v4, %v513_v2  ;;  %v304_v4 = vld [vmem:[#allocation2 + $0x40] sm:$0xff] }
  0xc3   : > { %v602_v6 = vadd.f32 %v563_v5, %v296_v3 }
  0xc5   : > { %619 = vst.msk [vmem:[#allocation2] sm:$0xff] %vm242_vm0, %v602_v6  ;;  %v543_v7 = vpop.f32.mrf.mxu3 }
  0xc7   : > { %v515_v8 = vpop.f32.mrf.mxu0 }
  0xc8   : > { %v564_v10 = vpop.f32.mrf.mxu1 }
  0xc9   : > { %v565_v11 = vadd.f32 %v564_v10, %v515_v8 }
  0xcb   : > { %v603_v12 = vadd.f32 %v565_v11, %v297_v9 }
  0xcc   : > { %v638_v13 = vld [vmem:[#allocation2] sm:$0xff] }
  0xcd   : > { %620 = vst.msk [vmem:[#allocation2 + $0x8] sm:$0xff] %vm242_vm0, %v603_v12  ;;  %1029 = vmatmul.msk.f32.vlgmr.msra.gmra.mxu2 %vm242_vm0, %v638_v13  ;;  %v545_v14 = vpop.f32.mrf.mxu3  ;;  %v305_v12 = vld [vmem:[#allocation2 + $0x48] sm:$0xff] }
  0xcf   : > { %v518_v15 = vpop.f32.mrf.mxu0 }
  0xd0   : > { %v567_v17 = vpop.f32.mrf.mxu1 }
  0xd1   : > { %v568_v18 = vadd.f32 %v567_v17, %v518_v15 }
  0xd3   : > { %v604_v19 = vadd.f32 %v568_v18, %v298_v16 }
  0xd4   : > { %v639_v20 = vld [vmem:[#allocation2 + $0x8] sm:$0xff] }
  0xd5   : > { %621 = vst.msk [vmem:[#allocation2 + $0x10] sm:$0xff] %vm242_vm0, %v604_v19  ;;  %1030 = vmatmul.msk.f32.gmra.mxu2 %vm242_vm0, %v639_v20  ;;  %v548_v21 = vpop.f32.mrf.mxu3  ;;  %v306_v19 = vld [vmem:[#allocation2 + $0x50] sm:$0xff] }
  0xd7   : > { %v520_v22 = vpop.f32.mrf.mxu0 }
  0xd8   : > { %v569_v24 = vpop.f32.mrf.mxu1 }
  0xd9   : > { %v570_v25 = vadd.f32 %v569_v24, %v520_v22 }
  0xdb   : > { %v605_v26 = vadd.f32 %v570_v25, %v299_v23  ;;  %v307_v25 = vld [vmem:[#allocation2 + $0x58] sm:$0xff] }
  0xdc   : > { %v640_v27 = vld [vmem:[#allocation2 + $0x10] sm:$0xff] }
  0xdd   : > { %622 = vst.msk [vmem:[#allocation2 + $0x18] sm:$0xff] %vm242_vm0, %v605_v26  ;;  %1031 = vmatmul.msk.f32.gmra.mxu2 %vm242_vm0, %v640_v27  ;;  %v550_v28 = vpop.f32.mrf.mxu3 }
  0xdf   : > { %v523_v29 = vpop.f32.mrf.mxu0 }
  0xe0   : > { %v572_v31 = vpop.f32.mrf.mxu1 }
  0xe1   : > { %v573_v32 = vadd.f32 %v572_v31, %v523_v29 }
  0xe3   : > { %v606_v33 = vadd.f32 %v573_v32, %v300_v30 }
  0xe4   : > { %v641_v34 = vld [vmem:[#allocation2 + $0x18] sm:$0xff] }
  0xe5   : > { %623 = vst.msk [vmem:[#allocation2 + $0x20] sm:$0xff] %vm242_vm0, %v606_v33  ;;  %1032 = vmatmul.msk.f32.gmra.mxu2 %vm242_vm0, %v641_v34  ;;  %v592_v36 = vpop.f32.mrf.mxu3  ;;  %v1169_v34 = vld [vmem:[%s1596_s3] ss:$0 sm:$0xff] }
  0xe6   : > { %v593_v40 = vadd.f32 %v592_v36, %v543_v7 }
  0xe7   : > { %v525_v37 = vpop.f32.mrf.mxu0 }
  0xe8   : > { %v574_v39 = vpop.f32.mrf.mxu1  ;;  %v614_v42 = vadd.f32 %v593_v40, %v308_v35 }
  0xe9   : > { %v575_v41 = vadd.f32 %v574_v39, %v525_v37 }
  0xea   : > { %631 = vst.msk [vmem:[#allocation2 + $0x60] sm:$0xff] %vm242_vm0, %v614_v42 }
  0xeb   : > { %v607_v43 = vadd.f32 %v575_v41, %v301_v38 }
  0xec   : > { %v642_v44 = vld [vmem:[#allocation2 + $0x20] sm:$0xff] }
  0xed   : > { %624 = vst.msk [vmem:[#allocation2 + $0x28] sm:$0xff] %vm242_vm0, %v607_v43  ;;  %1033 = vmatmul.msk.f32.gmra.mxu2 %vm242_vm0, %v642_v44  ;;  %v594_v46 = vpop.f32.mrf.mxu3 }
  0xee   : > { %v595_v50 = vadd.f32 %v594_v46, %v545_v14 }
  0xef   : > { %v528_v47 = vpop.f32.mrf.mxu0 }
  0xf0   : > { %v577_v49 = vpop.f32.mrf.mxu1  ;;  %v615_v52 = vadd.f32 %v595_v50, %v309_v45 }
  0xf1   : > { %v578_v51 = vadd.f32 %v577_v49, %v528_v47  ;;  %v650_v31 = vld [vmem:[#allocation2 + $0x60] sm:$0xff] }
  0xf2   : > { %632 = vst.msk [vmem:[#allocation2 + $0x68] sm:$0xff] %vm242_vm0, %v615_v52 }
  0xf3   : > { %v608_v53 = vadd.f32 %v578_v51, %v302_v48 }
  0xf4   : > { %v643_v54 = vld [vmem:[#allocation2 + $0x28] sm:$0xff] }
  0xf5   : > { %625 = vst.msk [vmem:[#allocation2 + $0x30] sm:$0xff] %vm242_vm0, %v608_v53  ;;  %1034 = vmatmul.msk.f32.gmra.mxu2 %vm242_vm0, %v643_v54  ;;  %v597_v56 = vpop.f32.mrf.mxu3 }
  0xf6   : > { %v598_v60 = vadd.f32 %v597_v56, %v548_v21 }
  0xf7   : > { %v530_v57 = vpop.f32.mrf.mxu0 }
  0xf8   : > { %v579_v59 = vpop.f32.mrf.mxu1  ;;  %v616_v62 = vadd.f32 %v598_v60, %v310_v55 }
  0xf9   : > { %v580_v61 = vadd.f32 %v579_v59, %v530_v57  ;;  %v651_v32 = vld [vmem:[#allocation2 + $0x68] sm:$0xff] }
  0xfa   : > { %633 = vst.msk [vmem:[#allocation2 + $0x70] sm:$0xff] %vm242_vm0, %v616_v62 }
  0xfb   : > { %v609_v63 = vadd.f32 %v580_v61, %v303_v58 }
  0xfc   : > { %v644_v0 = vld [vmem:[#allocation2 + $0x30] sm:$0xff] }
  0xfd   : > { %626 = vst.msk [vmem:[#allocation2 + $0x38] sm:$0xff] %vm242_vm0, %v609_v63  ;;  %1035 = vmatmul.msk.f32.gmra.mxu2 %vm242_vm0, %v644_v0  ;;  %v599_v2 = vpop.f32.mrf.mxu3 }
  0xfe   : > { %v600_v6 = vadd.f32 %v599_v2, %v550_v28 }
  0xff   : > { %v533_v3 = vpop.f32.mrf.mxu0 }
 0x100   : > { %v582_v5 = vpop.f32.mrf.mxu1  ;;  %v617_v8 = vadd.f32 %v600_v6, %v311_v1 }
 0x101   : > { %v583_v7 = vadd.f32 %v582_v5, %v533_v3  ;;  %v652_v33 = vld [vmem:[#allocation2 + $0x70] sm:$0xff] }
 0x102   : > { %634 = vst.msk [vmem:[#allocation2 + $0x78] sm:$0xff] %vm242_vm0, %v617_v8 }
 0x103   : > { %v610_v9 = vadd.f32 %v583_v7, %v304_v4 }
 0x104   : > { %v645_v10 = vld [vmem:[#allocation2 + $0x38] sm:$0xff] }
 0x105   : > { %627 = vst.msk [vmem:[#allocation2 + $0x40] sm:$0xff] %vm242_vm0, %v610_v9  ;;  %1036 = vmatmul.msk.f32.gmra.mxu2 %vm242_vm0, %v645_v10 }
 0x107   : > { %v535_v11 = vpop.f32.mrf.mxu0 }
 0x108   : > { %v584_v13 = vpop.f32.mrf.mxu1 }
 0x109   : > { %v585_v14 = vadd.f32 %v584_v13, %v535_v11  ;;  %v653_v16 = vld [vmem:[#allocation2 + $0x78] sm:$0xff] }
 0x10a   : > { %1044 = vmatmul.msk.f32.vlgmr.msra.gmra.mxu3 %vm242_vm0, %v653_v16 }
 0x10b   : > { %v611_v15 = vadd.f32 %v585_v14, %v305_v12 }
 0x10c   : > { %v646_v17 = vld [vmem:[#allocation2 + $0x40] sm:$0xff] }
 0x10d   : > { %628 = vst.msk [vmem:[#allocation2 + $0x48] sm:$0xff] %vm242_vm0, %v611_v15  ;;  %1037 = vmatmul.msk.f32.gmra.mxu2 %vm242_vm0, %v646_v17 }
 0x10f   : > { %v538_v18 = vpop.f32.mrf.mxu0 }
 0x110   : > { %v587_v20 = vpop.f32.mrf.mxu1 }
 0x111   : > { %v588_v21 = vadd.f32 %v587_v20, %v538_v18 }
 0x113   : > { %v612_v22 = vadd.f32 %v588_v21, %v306_v19 }
 0x114   : > { %v647_v23 = vld [vmem:[#allocation2 + $0x48] sm:$0xff] }
 0x115   : > { %629 = vst.msk [vmem:[#allocation2 + $0x50] sm:$0xff] %vm242_vm0, %v612_v22  ;;  %1038 = vmatmul.msk.f32.gmra.mxu2 %vm242_vm0, %v647_v23 }
 0x117   : > { %v540_v24 = vpop.f32.mrf.mxu0 }
 0x118   : > { %v589_v26 = vpop.f32.mrf.mxu1 }
 0x119   : > { %v590_v27 = vadd.f32 %v589_v26, %v540_v24 }
 0x11b   : > { %v613_v28 = vadd.f32 %v590_v27, %v307_v25 }
 0x11c   : > { %v648_v29 = vld [vmem:[#allocation2 + $0x50] sm:$0xff] }
 0x11d   : > { %630 = vst.msk [vmem:[#allocation2 + $0x58] sm:$0xff] %vm242_vm0, %v613_v28  ;;  %1039 = vmatmul.msk.f32.gmra.mxu2 %vm242_vm0, %v648_v29 }
 0x124   : > { %v649_v30 = vld [vmem:[#allocation2 + $0x58] sm:$0xff] }
 0x125   : > { %1040 = vmatmul.msk.f32.gmra.mxu2 %vm242_vm0, %v649_v30 }
 0x12d   : > { %1041 = vmatmul.msk.f32.gmra.mxu2 %vm242_vm0, %v650_v31 }
 0x135   : > { %1042 = vmatmul.msk.f32.gmra.mxu2 %vm242_vm0, %v651_v32 }
 0x13d   : > { %1043 = vmatmul.msk.f32.gmra.mxu2 %vm242_vm0, %v652_v33 }
 0x150   : > { %v724_v35 = vpop.f32.mrf.mxu2 }
 0x151   : > { %v725_v36 = vadd.f32 %v1169_v34, %v724_v35 }
 0x153   : > { %772 = vst [vmem:[%s1536_s14] sm:$0xff] %v725_v36 }
 0x158   : > { %v727_v37 = vpop.f32.mrf.mxu2 }
 0x159   : > { %v728_v38 = vadd.f32 %v1169_v34, %v727_v37 }
 0x15b   : > { %773 = vst [vmem:[%s1536_s14 + $0x8] sm:$0xff] %v728_v38 }
 0x160   : > { %v730_v39 = vpop.f32.mrf.mxu2 }
 0x161   : > { %v731_v40 = vadd.f32 %v1169_v34, %v730_v39 }
 0x163   : > { %774 = vst [vmem:[%s1536_s14 + $0x10] sm:$0xff] %v731_v40 }
 0x168   : > { %v733_v41 = vpop.f32.mrf.mxu2 }
 0x169   : > { %v734_v42 = vadd.f32 %v1169_v34, %v733_v41 }
 0x16b   : > { %775 = vst [vmem:[%s1536_s14 + $0x18] sm:$0xff] %v734_v42 }
 0x170   : > { %v736_v43 = vpop.f32.mrf.mxu2 }
 0x171   : > { %v737_v44 = vadd.f32 %v1169_v34, %v736_v43 }
 0x173   : > { %776 = vst [vmem:[%s1536_s14 + $0x20] sm:$0xff] %v737_v44 }
 0x178   : > { %v739_v45 = vpop.f32.mrf.mxu2 }
 0x179   : > { %v740_v46 = vadd.f32 %v1169_v34, %v739_v45 }
 0x17b   : > { %777 = vst [vmem:[%s1536_s14 + $0x28] sm:$0xff] %v740_v46 }
 0x180   : > { %v742_v47 = vpop.f32.mrf.mxu2 }
 0x181   : > { %v743_v48 = vadd.f32 %v1169_v34, %v742_v47 }
 0x183   : > { %778 = vst [vmem:[%s1536_s14 + $0x30] sm:$0xff] %v743_v48 }
 0x188   : > { %v745_v49 = vpop.f32.mrf.mxu2 }
 0x189   : > { %v746_v50 = vadd.f32 %v1169_v34, %v745_v49 }
 0x18b   : > { %779 = vst [vmem:[%s1536_s14 + $0x38] sm:$0xff] %v746_v50 }
 0x18d   : > { %v769_v51 = vpop.f32.mrf.mxu3 }
 0x18e   : > { %v770_v53 = vadd.f32 %v1169_v34, %v769_v51 }
 0x190   : > { %v748_v52 = vpop.f32.mrf.mxu2  ;;  %787 = vst [vmem:[%s1536_s14 + $0x78] sm:$0xff] %v770_v53 }
 0x191   : > { %v749_v54 = vadd.f32 %v1169_v34, %v748_v52 }
 0x193   : > { %780 = vst [vmem:[%s1536_s14 + $0x40] sm:$0xff] %v749_v54 }
 0x198   : > { %v751_v55 = vpop.f32.mrf.mxu2 }
 0x199   : > { %v752_v56 = vadd.f32 %v1169_v34, %v751_v55 }
 0x19b   : > { %781 = vst [vmem:[%s1536_s14 + $0x48] sm:$0xff] %v752_v56 }
 0x1a0   : > { %v754_v57 = vpop.f32.mrf.mxu2 }
 0x1a1   : > { %v755_v58 = vadd.f32 %v1169_v34, %v754_v57 }
 0x1a3   : > { %782 = vst [vmem:[%s1536_s14 + $0x50] sm:$0xff] %v755_v58 }
 0x1a8   : > { %v757_v59 = vpop.f32.mrf.mxu2 }
 0x1a9   : > { %v758_v60 = vadd.f32 %v1169_v34, %v757_v59 }
 0x1ab   : > { %783 = vst [vmem:[%s1536_s14 + $0x58] sm:$0xff] %v758_v60 }
 0x1b0   : > { %v760_v61 = vpop.f32.mrf.mxu2 }
 0x1b1   : > { %v761_v62 = vadd.f32 %v1169_v34, %v760_v61 }
 0x1b3   : > { %784 = vst [vmem:[%s1536_s14 + $0x60] sm:$0xff] %v761_v62 }
 0x1b8   : > { %v763_v63 = vpop.f32.mrf.mxu2 }
 0x1b9   : > { %v764_v0 = vadd.f32 %v1169_v34, %v763_v63 }
 0x1bb   : > { %785 = vst [vmem:[%s1536_s14 + $0x68] sm:$0xff] %v764_v0 }
 0x1c0   : > { %v766_v1 = vpop.f32.mrf.mxu2 }
 0x1c1   : > { %v767_v2 = vadd.f32 %v1169_v34, %v766_v1 }
 0x1c3   : > { %786 = vst [vmem:[%s1536_s14 + $0x70] sm:$0xff] %v767_v2 }
 0x1c4   : > { %1227 = shalt.err (!%p1224_p13)
}
 0x1c5   : > { %s1287_s24 = smov 128   ;;  %s1288_s27 = smov 8  }
 0x1c6   : > { %1104 = dma.vmem_to_hbm [thread:$0]  (%p1365_p9), %s802_s5, 2048, %s804_s7, %s789_s8, %s1287_s24, %s1287_s24, %s1288_s27  }
 0x1c7 PF: > { %s818_s14 = sand.u32 1, %s1262_s15   ;;  %p1111_p0 = pnand %p893_p12, %p1372_p11 }
 0x1c8   : > { %s819_s26 = scalar_lea.sflag [#allocation5], %s818_s14 }
 0x1c9   : > { %p1112_p1 = pneg %p1111_p0 }
 0x1cb   : > { %1257 = dma.done.wait (%p1112_p1), %s819_s26, 2048  }
 0x1cc   : > { %1259 = vsyncadd (%p1112_p1), %s819_s26, 4294965248  ;;  %s20_s20 = sadd.s32 1, %s1282_s20   ;;  %s1602_s15 = smov %s1266_s16 }
 0x1cd   : > { %p17_p2 = scmp.ge.s32.totalorder %s20_s20, 4   ;;  %s1603_s16 = smov %s1270_s17 }
 0x1ce   : > { %s1604_s17 = smov %s1370_s29  ;;  %s1605_s18 = smov %s1278_s19 }
 0x1cf   : > { %s1606_s19 = smov %s1608_s23  ;;  %19 = sbr.rel (!%p17_p2) target bundleno = 6 (0x6), region = 90 }
 0x1d4   :  { %825 = vsyncpa [#allocation4], 1 }
 0x1d5   :  { %827 = vsyncpa [#allocation4 + $0x1], 1 }
 0x1d6   :  { %828 = vsyncpa [#allocation5], 1 }
 0x1d7   :  { %830 = vsyncpa [#allocation5 + $0x1], 1 }

</bundles_post_ra>
